<compile_context>
chip_gen: v7x
topology: tpu7x:2x2x1
jax: 0.10.0
libtpu: 0.0.40
codegen_flags: <defaults>
</compile_context>

<pallas_src>
import jax
import jax.numpy as jnp
from jax.experimental import pallas as pl
from jax.experimental.pallas import tpu as pltpu


def _round_up(n, m):
    return (n + m - 1) // m * m


def _largest_divisor_leq(n, cap):
    for u in range(min(cap, n), 0, -1):
        if n % u == 0:
            return u
    return 1


def _vmem_limit(*, resident, blocks):
    # Explicit scoped-VMEM budget: resident weights + double-buffered per-step blocks, with
    # headroom.  v5e's default scoped limit is 16 MiB; clamp below v7x's 64 MiB physical VMEM.
    est = resident + 2 * blocks
    return int(min(max(2 * est, 16 << 20), 48 << 20))


# ----------------------------------------------------------------------------
# Stage A: x-gate precompute  gx = x @ [W_ir|W_iz|W_in] + b   (parallel grid)
# ----------------------------------------------------------------------------
def _x_gates_kernel(x_ref, w_x_ref, b_x_ref, gx_ref):
    u, bp, ip = x_ref.shape
    x2d = x_ref[...].reshape(u * bp, ip)                       # layout-trivial merge (bp % 8 == 0)
    g = jnp.dot(x2d, w_x_ref[...], preferred_element_type=jnp.float32) + b_x_ref[...]
    gx_ref[...] = g.reshape(u, bp, g.shape[-1])


# ----------------------------------------------------------------------------
# Stage B: sequential GRU recurrence (h-dependent half only), U steps per grid iter
# ----------------------------------------------------------------------------
def _gru_recurrence_kernel(gx_ref, m0_ref, w_h_ref, b_h_ref,
                           hseq_ref, m_out_ref, h_ref):
    u = gx_ref.shape[0]
    hp = m0_ref.shape[-1]
    blk = pl.program_id(0)

    @pl.when(blk == 0)
    def _():
        h_ref[...] = m0_ref[...]                # load initial hidden state once

    h = h_ref[...]                              # (Bp, Hp) f32, carried in registers below

    # Static unroll over the U timesteps of this block: amortizes per-grid-step overhead and
    # coalesces the gx / h_seq DMAs.  Only the h-dependent gate half is on the critical path.
    for s in range(u):
        gh = jnp.dot(h.astype(jnp.bfloat16), w_h_ref[...],
                     preferred_element_type=jnp.float32) + b_h_ref[...]    # (Bp, 3*Hp)
        gx = gx_ref[s]                                                     # (Bp, 3*Hp) f32
        r = jax.nn.sigmoid(gx[:, 0 * hp:1 * hp] + gh[:, 0 * hp:1 * hp])
        z = jax.nn.sigmoid(gx[:, 1 * hp:2 * hp] + gh[:, 1 * hp:2 * hp])
        n = jnp.tanh(gx[:, 2 * hp:3 * hp] + r * gh[:, 2 * hp:3 * hp])
        h = (1.0 - z) * n + z * h
        hseq_ref[s] = h.astype(jnp.bfloat16)    # bf16 writeback halves the per-step DMA

    h_ref[...] = h                              # carry to the next grid iteration

    @pl.when(blk == pl.num_programs(0) - 1)
    def _():
        m_out_ref[...] = h                      # single f32 HBM writeback of the final hidden


# ----------------------------------------------------------------------------
# Stage C: BN-folded Linear + ELU over the whole hidden sequence (parallel grid)
# ----------------------------------------------------------------------------
def _fc_elu_kernel(h_ref, w_fc_ref, b_fc_ref, y_ref):
    u, bp, hp = h_ref.shape
    h2d = h_ref[...].reshape(u * bp, hp)
    y = jnp.dot(h2d, w_fc_ref[...], preferred_element_type=jnp.float32) + b_fc_ref[...]
    y = jnp.where(y > 0.0, y, jnp.expm1(jnp.minimum(y, 0.0)))   # ELU(alpha=1), no inf intermediate
    y_ref[...] = y.reshape(u, bp, hp)


# ----------------------------------------------------------------------------
# Parameter preparation: BN folding, gate-block layout, padding, bf16 cast
# ----------------------------------------------------------------------------
def prepare_params(params, *, eps=1e-5, lane=128):
    I = params["w_ih_t"].shape[0]
    H = params["w_hh_t"].shape[0]
    Ip = _round_up(I, lane)
    Hp = _round_up(H, lane)

    w_ih, w_hh = params["w_ih_t"], params["w_hh_t"]             # (I,3H), (H,3H)
    b_ih = params["b_ih"].reshape(3 * H)
    b_hh = params["b_hh"].reshape(3 * H)
    w_ir, w_iz, w_in = w_ih[:, :H], w_ih[:, H:2 * H], w_ih[:, 2 * H:]
    w_hr, w_hz, w_hn = w_hh[:, :H], w_hh[:, H:2 * H], w_hh[:, 2 * H:]
    b_ir, b_iz, b_in = b_ih[:H], b_ih[H:2 * H], b_ih[2 * H:]
    b_hr, b_hz, b_hn = b_hh[:H], b_hh[H:2 * H], b_hh[2 * H:]

    # x-gate weight (Ip, 3*Hp), lane-aligned column blocks [r | z | n]; r/z biases fold here.
    w_x = jnp.zeros((Ip, 3 * Hp), jnp.float32)
    w_x = w_x.at[:I, 0 * Hp:0 * Hp + H].set(w_ir)
    w_x = w_x.at[:I, 1 * Hp:1 * Hp + H].set(w_iz)
    w_x = w_x.at[:I, 2 * Hp:2 * Hp + H].set(w_in)
    b_x = jnp.zeros((1, 3 * Hp), jnp.float32)
    b_x = b_x.at[0, 0 * Hp:0 * Hp + H].set(b_ir + b_hr)
    b_x = b_x.at[0, 1 * Hp:1 * Hp + H].set(b_iz + b_hz)
    b_x = b_x.at[0, 2 * Hp:2 * Hp + H].set(b_in)

    # h-gate weight (Hp, 3*Hp) [r | z | n]; only the n gate keeps its h bias
    # (PyTorch GRUCell: n = tanh(gx_n + r * (h @ W_hn + b_hn))).
    w_h = jnp.zeros((Hp, 3 * Hp), jnp.float32)
    w_h = w_h.at[:H, 0 * Hp:0 * Hp + H].set(w_hr)
    w_h = w_h.at[:H, 1 * Hp:1 * Hp + H].set(w_hz)
    w_h = w_h.at[:H, 2 * Hp:2 * Hp + H].set(w_hn)
    b_h = jnp.zeros((1, 3 * Hp), jnp.float32)
    b_h = b_h.at[0, 2 * Hp:2 * Hp + H].set(b_hn)

    # Fold eval-mode BatchNorm1d into the Linear layer (affine-into-affine).
    scale = params["bn_gamma"].reshape(H) * jax.lax.rsqrt(params["bn_var"].reshape(H) + eps)
    shift = params["bn_beta"].reshape(H) - params["bn_mean"].reshape(H) * scale
    lin_w = params["lin_w_t"]                                   # (H, H) input-major
    lin_b = params["lin_b"].reshape(H)
    w_fc = scale[:, None] * lin_w
    b_fc = shift @ lin_w + lin_b

    w_fc_p = jnp.zeros((Hp, Hp), jnp.float32).at[:H, :H].set(w_fc)
    b_fc_p = jnp.zeros((1, Hp), jnp.float32).at[0, :H].set(b_fc)

    return {
        "w_x": w_x.astype(jnp.bfloat16),
        "b_x": b_x,
        "w_h": w_h.astype(jnp.bfloat16),
        "b_h": b_h,
        "w_fc": w_fc_p.astype(jnp.bfloat16),
        "b_fc": b_fc_p,
        "dims": (I, H, Ip, Hp),
    }


# ----------------------------------------------------------------------------
# Wrapper: T-step rollout = parallel x-precompute -> sequential recurrence -> parallel FC+ELU
# ----------------------------------------------------------------------------
def gru_fc_rollout(x_seq, m0, prep, *, u_max=8):
    """x_seq: (T, B, I) f32, m0: (B, H) f32 -> (out: (T, B, H) f32, m_T: (B, H) f32)."""
    I, H, Ip, Hp = prep["dims"]
    T, B, _ = x_seq.shape
    Bp = _round_up(B, 16)                     # multiple of 16: aligns bf16 (16,128) sublane packing
    U = _largest_divisor_leq(T, u_max)        # timesteps per grid iteration (U divides T)
    n_blk = T // U
    f32, bf16 = jnp.float32, jnp.bfloat16

    x_p = jnp.zeros((T, Bp, Ip), bf16).at[:, :B, :I].set(x_seq.astype(bf16))
    m_p = jnp.zeros((Bp, Hp), f32).at[:B, :H].set(m0)

    # ---- Stage A: x-gate contributions for all timesteps (parallel over time blocks) ----
    gx = pl.pallas_call(
        _x_gates_kernel,
        out_shape=jax.ShapeDtypeStruct((T, Bp, 3 * Hp), f32),
        grid_spec=pltpu.PrefetchScalarGridSpec(
            num_scalar_prefetch=0,
            grid=(n_blk,),
            in_specs=[
                pl.BlockSpec((U, Bp, Ip), lambda t: (t, 0, 0)),       # x block
                pl.BlockSpec((Ip, 3 * Hp), lambda t: (0, 0)),         # W_x (resident)
                pl.BlockSpec((1, 3 * Hp), lambda t: (0, 0)),          # b_x (resident)
            ],
            out_specs=pl.BlockSpec((U, Bp, 3 * Hp), lambda t: (t, 0, 0)),
        ),
        compiler_params=pltpu.CompilerParams(
            dimension_semantics=("parallel",),                        # megacore-shardable on v7x
            vmem_limit_bytes=_vmem_limit(
                resident=Ip * 3 * Hp * 2 + 3 * Hp * 4,
                blocks=U * Bp * (Ip * 2 + 3 * Hp * 4)),
        ),
    )(x_p, prep["w_x"], prep["b_x"])

    # ---- Stage B: sequential recurrence, only the h-dependent gate half in the loop ----
    h_seq, m_T = pl.pallas_call(
        _gru_recurrence_kernel,
        out_shape=(
            jax.ShapeDtypeStruct((T, Bp, Hp), bf16),                  # hidden-state sequence
            jax.ShapeDtypeStruct((Bp, Hp), f32),                      # final hidden state
        ),
        grid_spec=pltpu.PrefetchScalarGridSpec(
            num_scalar_prefetch=0,
            grid=(n_blk,),
            in_specs=[
                pl.BlockSpec((U, Bp, 3 * Hp), lambda t: (t, 0, 0)),   # gx block (per U steps)
                pl.BlockSpec((Bp, Hp), lambda t: (0, 0)),             # m0 (resident)
                pl.BlockSpec((Hp, 3 * Hp), lambda t: (0, 0)),         # W_h (resident)
                pl.BlockSpec((1, 3 * Hp), lambda t: (0, 0)),          # b_h (resident)
            ],
            out_specs=(
                pl.BlockSpec((U, Bp, Hp), lambda t: (t, 0, 0)),
                pl.BlockSpec((Bp, Hp), lambda t: (0, 0)),
            ),
            scratch_shapes=[pltpu.VMEM((Bp, Hp), f32)],               # resident hidden state
        ),
        compiler_params=pltpu.CompilerParams(
            dimension_semantics=("arbitrary",),                       # true recurrence
            vmem_limit_bytes=_vmem_limit(
                resident=Hp * 3 * Hp * 2 + 3 * Hp * 4 + 3 * Bp * Hp * 4,
                blocks=U * Bp * (3 * Hp * 4 + Hp * 2)),
        ),
    )(gx, m_p, prep["w_h"], prep["b_h"])

    # ---- Stage C: BN-folded Linear + ELU over the whole sequence (parallel over time) ----
    y = pl.pallas_call(
        _fc_elu_kernel,
        out_shape=jax.ShapeDtypeStruct((T, Bp, Hp), f32),
        grid_spec=pltpu.PrefetchScalarGridSpec(
            num_scalar_prefetch=0,
            grid=(n_blk,),
            in_specs=[
                pl.BlockSpec((U, Bp, Hp), lambda t: (t, 0, 0)),       # hidden block (bf16)
                pl.BlockSpec((Hp, Hp), lambda t: (0, 0)),             # BN-folded Linear W
                pl.BlockSpec((1, Hp), lambda t: (0, 0)),              # BN-folded Linear b
            ],
            out_specs=pl.BlockSpec((U, Bp, Hp), lambda t: (t, 0, 0)),
        ),
        compiler_params=pltpu.CompilerParams(
            dimension_semantics=("parallel",),
            vmem_limit_bytes=_vmem_limit(
                resident=Hp * Hp * 2 + Hp * 4,
                blocks=U * Bp * (Hp * 2 + Hp * 4)),
        ),
    )(h_seq, prep["w_fc"], prep["b_fc"])

    return y[:, :B, :H], m_T[:B, :H]


def processing_module_forward(x, m, prep):
    """Matches ProcessingModule.forward: x (B,1,I), m (B,H) -> (fc_out, m_new)."""
    x_seq = jnp.transpose(x, (1, 0, 2))        # squeeze(1) as a length-1 time axis
    out_seq, m_new = gru_fc_rollout(x_seq, m, prep)
    return out_seq[0], m_new


# ----------------------------------------------------------------------------
# Parameter init + references
# ----------------------------------------------------------------------------
def init_params(key, input_size, hidden_size):
    """Deterministic init mimicking PyTorch default uniform(-1/sqrt(H), 1/sqrt(H))."""
    ks = jax.random.split(key, 6)
    bound = 1.0 / jnp.sqrt(jnp.float32(hidden_size))

    def u(k, shape):
        return jax.random.uniform(k, shape, jnp.float32, -bound, bound)

    H, I = hidden_size, input_size
    return {
        "w_ih_t": u(ks[0], (I, 3 * H)),
        "w_hh_t": u(ks[1], (H, 3 * H)),
        "b_ih": u(ks[2], (1, 3 * H)),
        "b_hh": u(ks[3], (1, 3 * H)),
        "bn_gamma": jnp.ones((1, H), jnp.float32),
        "bn_beta": jnp.zeros((1, H), jnp.float32),
        "bn_mean": jnp.zeros((1, H), jnp.float32),
        "bn_var": jnp.ones((1, H), jnp.float32),
        "lin_w_t": u(ks[4], (H, H)),
        "lin_b": u(ks[5], (1, H)),
    }


def _mirrored_reference(x_seq, m0, prep):
    """Pure-JAX reference reproducing the kernel math (same bf16-rounded operands/stages)."""
    I, H, Ip, Hp = prep["dims"]
    T, B, _ = x_seq.shape
    P = jax.lax.Precision.HIGHEST
    w_x = prep["w_x"].astype(jnp.float32)
    w_h = prep["w_h"].astype(jnp.float32)
    w_fc = prep["w_fc"].astype(jnp.float32)
    b_x, b_h, b_fc = prep["b_x"], prep["b_h"], prep["b_fc"]

    x_p = jnp.zeros((T, B, Ip), jnp.float32).at[:, :, :I].set(x_seq)
    x_p = x_p.astype(jnp.bfloat16).astype(jnp.float32)
    h = jnp.zeros((B, Hp), jnp.float32).at[:, :H].set(m0)

    gx_all = jnp.dot(x_p.reshape(T * B, Ip), w_x, precision=P).reshape(T, B, 3 * Hp) + b_x

    hs = []
    for t in range(T):
        hb = h.astype(jnp.bfloat16).astype(jnp.float32)
        gh = jnp.dot(hb, w_h, precision=P) + b_h
        gx = gx_all[t]
        r = jax.nn.sigmoid(gx[:, 0 * Hp:1 * Hp] + gh[:, 0 * Hp:1 * Hp])
        z = jax.nn.sigmoid(gx[:, 1 * Hp:2 * Hp] + gh[:, 1 * Hp:2 * Hp])
        n = jnp.tanh(gx[:, 2 * Hp:3 * Hp] + r * gh[:, 2 * Hp:3 * Hp])
        h = (1.0 - z) * n + z * h
        hs.append(h.astype(jnp.bfloat16).astype(jnp.float32))
    h_seq = jnp.stack(hs)
    y = jnp.dot(h_seq.reshape(T * B, Hp), w_fc, precision=P).reshape(T, B, Hp) + b_fc
    y = jnp.where(y > 0.0, y, jnp.expm1(jnp.minimum(y, 0.0)))
    return y[:, :, :H], h[:, :H]


def _exact_reference(x_seq, m0, params, eps=1e-5):
    """Full-f32, PyTorch-exact reference (unfused, unpadded)."""
    H = m0.shape[1]

    def step(h, x):
        gi = x @ params["w_ih_t"] + params["b_ih"]
        gh = h @ params["w_hh_t"] + params["b_hh"]
        r = jax.nn.sigmoid(gi[:, :H] + gh[:, :H])
        z = jax.nn.sigmoid(gi[:, H:2 * H] + gh[:, H:2 * H])
        n = jnp.tanh(gi[:, 2 * H:] + r * gh[:, 2 * H:])
        h_new = (1.0 - z) * n + z * h
        y = (h_new - params["bn_mean"]) * jax.lax.rsqrt(params["bn_var"] + eps)
        y = y * params["bn_gamma"] + params["bn_beta"]
        y = y @ params["lin_w_t"] + params["lin_b"]
        y = jnp.where(y > 0.0, y, jnp.expm1(y))
        return h_new, y

    h, ys = jax.lax.scan(step, m0, x_seq)
    return ys, h


if __name__ == "__main__":
    INPUT_SIZE, HIDDEN_SIZE, BATCH, T = 16, 32, 8, 6

    key = jax.random.PRNGKey(0)
    kx, km, kp, ks = jax.random.split(key, 4)

    params = init_params(kp, INPUT_SIZE, HIDDEN_SIZE)
    prep = prepare_params(params)

    # --- single-step forward (exactly ProcessingModule.forward) ---
    x = jax.random.normal(kx, (BATCH, 1, INPUT_SIZE), jnp.float32)
    m = jax.random.normal(km, (BATCH, HIDDEN_SIZE), jnp.float32)

    out, m_new = jax.block_until_ready(processing_module_forward(x, m, prep))

    x_seq1 = jnp.transpose(x, (1, 0, 2))
    mir_out, mir_m = _mirrored_reference(x_seq1, m, prep)
    assert jnp.allclose(out, mir_out[0], atol=5e-4, rtol=5e-4), "out mismatch (mirrored)"
    assert jnp.allclose(m_new, mir_m, atol=5e-4, rtol=5e-4), "m mismatch (mirrored)"

    with jax.default_matmul_precision("float32"):
        ex_out, ex_m = _exact_reference(x_seq1, m, params)
    assert jnp.allclose(out, ex_out[0], atol=1e-1), "out mismatch (exact f32 sanity)"
    assert jnp.allclose(m_new, ex_m, atol=1e-1), "m mismatch (exact f32 sanity)"

    # --- multi-step rollout: single-block unroll (U=T) ---
    x_seq = jax.random.normal(ks, (T, BATCH, INPUT_SIZE), jnp.float32)
    out_seq, m_T = jax.block_until_ready(gru_fc_rollout(x_seq, m, prep))
    ref_seq, ref_mT = _mirrored_reference(x_seq, m, prep)
    assert jnp.allclose(out_seq, ref_seq, atol=5e-4, rtol=5e-4), "rollout out mismatch"
    assert jnp.allclose(m_T, ref_mT, atol=5e-4, rtol=5e-4), "rollout m mismatch"

    # --- multi-step rollout with multiple sequential grid blocks (U=2, 3 grid steps):
    #     exercises the hidden-state carry through VMEM scratch across grid iterations ---
    out_seq2, m_T2 = jax.block_until_ready(gru_fc_rollout(x_seq, m, prep, u_max=2))
    assert jnp.allclose(out_seq2, ref_seq, atol=5e-4, rtol=5e-4), "blocked rollout out mismatch"
    assert jnp.allclose(m_T2, ref_mT, atol=5e-4, rtol=5e-4), "blocked rollout m mismatch"

    print("KERNEL_OK")
</pallas_src>

<mosaic_0001>
module attributes {stable_mosaic.version = 11 : i64} {
  func.func @_x_gates_kernel(%arg0: i32, %arg1: memref<1x16x128xbf16, #tpu.memory_space<vmem>>, %arg2: memref<128x384xbf16, #tpu.memory_space<vmem>>, %arg3: memref<1x384xf32, #tpu.memory_space<vmem>>, %arg4: memref<1x16x384xf32, #tpu.memory_space<vmem>>) attributes {dimension_semantics = [#tpu.dimension_semantics<parallel>], iteration_bounds = array<i64: 1>, scalar_prefetch = 0 : i64, scratch_operands = 0 : i64, tpu.core_type = #tpu.core_type<tc>, window_params = [{transform_indices = @transform_0, window_bounds = array<i64: 1, 16, 128>}, {pipeline_mode = #tpu.pipeline_mode<synchronous>, transform_indices = @transform_1, window_bounds = array<i64: 128, 384>}, {pipeline_mode = #tpu.pipeline_mode<synchronous>, transform_indices = @transform_2, window_bounds = array<i64: 1, 384>}, {transform_indices = @transform_3, window_bounds = array<i64: 1, 16, 384>}]} {
    %c0 = arith.constant 0 : index
    %c0_0 = arith.constant 0 : index
    %c0_1 = arith.constant 0 : index
    %0 = vector.load %arg1[%c0, %c0_0, %c0_1] : memref<1x16x128xbf16, #tpu.memory_space<vmem>>, vector<1x16x128xbf16>
    %1 = vector.shape_cast %0 : vector<1x16x128xbf16> to vector<16x128xbf16>
    %c0_2 = arith.constant 0 : index
    %c0_3 = arith.constant 0 : index
    %2 = vector.load %arg2[%c0_2, %c0_3] : memref<128x384xbf16, #tpu.memory_space<vmem>>, vector<128x384xbf16>
    %cst = arith.constant dense<0.000000e+00> : vector<16x384xf32>
    %3 = tpu.matmul %1, %2, %cst {dimension_numbers = #tpu.dot_dimension_numbers<[1], [0], [0], [1], [0, 0, 1, 1], [], []>} : vector<16x128xbf16>, vector<128x384xbf16>, vector<16x384xf32> -> vector<16x384xf32>
    %c0_4 = arith.constant 0 : index
    %c0_5 = arith.constant 0 : index
    %4 = vector.load %arg3[%c0_4, %c0_5] : memref<1x384xf32, #tpu.memory_space<vmem>>, vector<1x384xf32>
    %5 = vector.broadcast %4 : vector<1x384xf32> to vector<16x384xf32>
    %6 = arith.addf %3, %5 : vector<16x384xf32>
    %7 = vector.shape_cast %6 : vector<16x384xf32> to vector<1x16x384xf32>
    %c0_6 = arith.constant 0 : index
    %c0_7 = arith.constant 0 : index
    %c0_8 = arith.constant 0 : index
    %8 = vector.load %arg4[%c0_6, %c0_7, %c0_8] : memref<1x16x384xf32, #tpu.memory_space<vmem>>, vector<1x16x384xf32>
    tpu.vector_store %arg4[%c0_6, %c0_7, %c0_8], %7 {strides = array<i32>} : memref<1x16x384xf32, #tpu.memory_space<vmem>>, vector<1x16x384xf32>,
    return
  }
  func.func @transform_0(%arg0: i32) -> (i32, i32, i32) {
    %c0_i32 = arith.constant 0 : i32
    %c0_i32_0 = arith.constant 0 : i32
    %c0_i32_1 = arith.constant 0 : i32
    return %arg0, %c0_i32, %c0_i32_0 : i32, i32, i32
  }
  func.func @transform_1(%arg0: i32) -> (i32, i32) {
    %c0_i32 = arith.constant 0 : i32
    %c0_i32_0 = arith.constant 0 : i32
    %c0_i32_1 = arith.constant 0 : i32
    return %c0_i32, %c0_i32_0 : i32, i32
  }
  func.func @transform_2(%arg0: i32) -> (i32, i32) {
    %c0_i32 = arith.constant 0 : i32
    %c0_i32_0 = arith.constant 0 : i32
    %c0_i32_1 = arith.constant 0 : i32
    return %c0_i32, %c0_i32_0 : i32, i32
  }
  func.func @transform_3(%arg0: i32) -> (i32, i32, i32) {
    %c0_i32 = arith.constant 0 : i32
    %c0_i32_0 = arith.constant 0 : i32
    %c0_i32_1 = arith.constant 0 : i32
    return %arg0, %c0_i32, %c0_i32_0 : i32, i32, i32
  }
}

</mosaic_0001>

<bundles_post_ra>
// kernel: tpu_custom_call.1
= control target key start
LH: loop header
LB: loop body
LE: loop exit
PB: predicated region body
PF: predicated region fallthrough
CT: control target
= control target key end

     0   :  { %8 = vsyncpa [#allocation3], 0  ;;  %s579_s0 = inlined_call_operand.hbm [shape: bf16[1,16,128], index: 0, kind: input, shape index: {}]   ;;  %s580_s1 = inlined_call_operand.hbm [shape: bf16[128,384], index: 1, kind: input, shape index: {}]   ;;  %s581_s2 = inlined_call_operand.vmem [shape: f32[1,384], index: 2, kind: input, shape index: {}]   ;;  %s582_s3 = inlined_call_operand.hbm [shape: f32[1,16,384], index: 3, kind: output, shape index: {}]  }
   0x1   :  { %9 = vsyncpa [#allocation6], 0 }
   0x2   :  { %10 = vsyncpa [#allocation4], 0  ;;  %s508_s12 = smov [#allocation2]   ;;  %s436_s16 = scalar_lea.hbm %s579_s0, 128 }
   0x3   :  { %s16_s13 = sshll.u32 %s508_s12, 4  ;;  %p437_p0 = scmp.ne.s32.totalorder %s579_s0, %s436_s16  ;;  %s17_s13 = int_to_ptr.vmem [resolvable:$true] %s16_s13 }
   0x4   :  { %p440_p1 = scmp.lt.u32.totalorder %s436_s16, %s579_s0 }
   0x6   :  { %p442_p2 = pnand %p440_p1, %p437_p0 }
   0x8   :  { %445 = shalt.err (!%p442_p2)
}
   0x9   :  { %s446_s21 = scalar_lea.vmem %s17_s13, 128  ;;  %p451_p4 = scmp.lt.s32.totalorder %s17_s13, %s17_s13 }
   0xa   :  { %p447_p3 = scmp.ne.s32.totalorder %s17_s13, %s446_s21  ;;  %p452_p5 = scmp.lt.s32.totalorder %s446_s21, %s446_s21 }
   0xc   :  { %p453_p6 = por %p452_p5, %p451_p4 }
   0xe   :  { %p454_p7 = pnand %p453_p6, %p447_p3 }
  0x10   :  { %457 = shalt.err (!%p454_p7)
}
  0x11   :  { %s509_s22 = smov 64   ;;  %s510_s23 = smov 4  }
  0x12   :  { %22 = dma.hbm_to_vmem [thread:$0]  %s579_s0, 128, %s17_s13, [#allocation3], %s509_s22, %s509_s22, %s510_s23  }
  0x13   :  { %s511_s26 = smov [#allocation5]   ;;  %s458_s30 = scalar_lea.hbm %s580_s1, 3072 }
  0x14   :  { %s28_s27 = sshll.u32 %s511_s26, 4  ;;  %p459_p8 = scmp.ne.s32.totalorder %s580_s1, %s458_s30  ;;  %s29_s27 = int_to_ptr.vmem [resolvable:$true] %s28_s27 }
  0x15   :  { %p462_p9 = scmp.lt.u32.totalorder %s458_s30, %s580_s1 }
  0x17   :  { %p464_p10 = pnand %p462_p9, %p459_p8 }
  0x19   :  { %467 = shalt.err (!%p464_p10)
}
  0x1a   :  { %s468_s8 = scalar_lea.vmem %s29_s27, 3072  ;;  %p473_p12 = scmp.lt.s32.totalorder %s29_s27, %s29_s27 }
  0x1b   :  { %p469_p11 = scmp.ne.s32.totalorder %s29_s27, %s468_s8  ;;  %p474_p13 = scmp.lt.s32.totalorder %s468_s8, %s468_s8 }
  0x1d   :  { %p475_p0 = por %p474_p13, %p473_p12 }
  0x1f   :  { %p476_p1 = pnand %p475_p0, %p469_p11 }
  0x21   :  { %479 = shalt.err (!%p476_p1)
}
  0x22   :  { %s512_s0 = smov 192   ;;  %s513_s9 = smov 12  }
  0x23   :  { %34 = dma.hbm_to_vmem [thread:$0]  %s580_s1, 3072, %s29_s27, [#allocation6], %s512_s0, %s512_s0, %s513_s9  }
  0x24   :  { %502 = dma.done.wait [#allocation3], 128  }
  0x25   :  { %503 = vsyncadd [#allocation3], 4294967168 }
  0x26   :  { %504 = dma.done.wait [#allocation6], 3072  }
  0x27   :  { %505 = vsyncadd [#allocation6], 4294964224  ;;  %v514_v0 = vmov 0.0   ;;  %vm515_vm0 = vmmov 0   ;;  %v516_v1 = vmov 0   ;;  %v435_v26 = vld [vmem:[#allocation2] sm:$0xff]   ;;  %v80_v27 = vlaneseq }
  0x28   :  { %371 = vmatprep.subr.bf16.mxu1 %v514_v0  ;;  %387 = vmatprep.mubr.msk.bf16.mxu1 %vm515_vm0, %v514_v0  ;;  %v403_v2 = vld [vmem:[#allocation5 + $0x4] ss:$12 sps:$4 sm:$0xff]   ;;  %v405_v3 = vld [vmem:[#allocation5 + $0x8] ss:$12 sps:$4 sm:$0xff]   ;;  %v406_v4 = vld [vmem:[#allocation5] ss:$12 sps:$4 sm:$0xff]  }
  0x29   :  { %261 = vmatprep.mubr.bf16.mxu0 %v516_v1  ;;  %229 = vmatprep.subr.bf16.mxu0 %v403_v2  ;;  %v407_v5 = vld [vmem:[#allocation5 + $0x1c] ss:$12 sps:$4 sm:$0xff]   ;;  %v409_v6 = vld [vmem:[#allocation5 + $0x20] ss:$12 sps:$4 sm:$0xff]   ;;  %v410_v7 = vld [vmem:[#allocation5 + $0x18] ss:$12 sps:$4 sm:$0xff]  }
  0x2a   :  { %372 = vmatpush3.bf16.msra.mxu1 %v405_v3  ;;  %230 = vmatpush1.bf16.msra.mxu0 %v406_v4  ;;  %v411_v8 = vld [vmem:[#allocation5 + $0x34] ss:$12 sps:$4 sm:$0xff]   ;;  %v413_v9 = vld [vmem:[#allocation5 + $0x38] ss:$12 sps:$4 sm:$0xff]   ;;  %v414_v10 = vld [vmem:[#allocation5 + $0x30] ss:$12 sps:$4 sm:$0xff]  }
  0x2b   :  { %373 = vmatprep.subr.bf16.mxu1 %v514_v0  ;;  %231 = vmatprep.subr.bf16.mxu0 %v407_v5  ;;  %v415_v11 = vld [vmem:[#allocation5 + $0x4c] ss:$12 sps:$4 sm:$0xff]   ;;  %v417_v12 = vld [vmem:[#allocation5 + $0x50] ss:$12 sps:$4 sm:$0xff]   ;;  %v418_v13 = vld [vmem:[#allocation5 + $0x48] ss:$12 sps:$4 sm:$0xff]  }
  0x2c   :  { %v419_v14 = vld [vmem:[#allocation5 + $0x64] ss:$12 sps:$4 sm:$0xff]   ;;  %v421_v15 = vld [vmem:[#allocation5 + $0x68] ss:$12 sps:$4 sm:$0xff]   ;;  %v422_v16 = vld [vmem:[#allocation5 + $0x60] ss:$12 sps:$4 sm:$0xff]  }
  0x2d   :  { %v423_v17 = vld [vmem:[#allocation5 + $0x7c] ss:$12 sps:$4 sm:$0xff]   ;;  %v425_v18 = vld [vmem:[#allocation5 + $0x80] ss:$12 sps:$4 sm:$0xff]   ;;  %v426_v19 = vld [vmem:[#allocation5 + $0x78] ss:$12 sps:$4 sm:$0xff]  }
  0x2e   :  { %374 = vmatpush3.bf16.msra.mxu1 %v409_v6  ;;  %232 = vmatpush1.bf16.msra.mxu0 %v410_v7  ;;  %v427_v20 = vld [vmem:[#allocation5 + $0x94] ss:$12 sps:$4 sm:$0xff]   ;;  %v429_v21 = vld [vmem:[#allocation5 + $0x98] ss:$12 sps:$4 sm:$0xff]   ;;  %v430_v22 = vld [vmem:[#allocation5 + $0x90] ss:$12 sps:$4 sm:$0xff]  }
  0x2f   :  { %375 = vmatprep.subr.bf16.mxu1 %v514_v0  ;;  %233 = vmatprep.subr.bf16.mxu0 %v411_v8  ;;  %v431_v23 = vld [vmem:[#allocation5 + $0xac] ss:$12 sps:$4 sm:$0xff]   ;;  %v433_v24 = vld [vmem:[#allocation5 + $0xb0] ss:$12 sps:$4 sm:$0xff]   ;;  %v434_v25 = vld [vmem:[#allocation5 + $0xa8] ss:$12 sps:$4 sm:$0xff]  }
  0x30   :  { %v81_v28 = vshrl.u32 %v80_v27, 7  ;;  %v78_v30 = vld [vmem:[%s581_s2] sm:$0x7]  ;;  %s517_s13 = smov [#allocation7]  }
  0x31   :  { %s324_s14 = sshll.u32 %s517_s13, 4  ;;  %s325_s14 = int_to_ptr.vmem [resolvable:$true] %s324_s14 }
  0x32   :  { %376 = vmatpush3.bf16.msra.mxu1 %v413_v9  ;;  %234 = vmatpush1.bf16.msra.mxu0 %v414_v10  ;;  %v90_v29 = vsub.s32 2, %v81_v28  ;;  %v82_v31 = vsub.s32 0, %v81_v28  ;;  %v86_v32 = vsub.s32 1, %v81_v28  ;;  %s480_s2 = scalar_lea.vmem %s325_s14, 768  ;;  %p485_p3 = scmp.lt.s32.totalorder %s325_s14, %s325_s14 }
  0x33   :  { %377 = vmatprep.subr.bf16.mxu1 %v514_v0  ;;  %235 = vmatprep.subr.bf16.mxu0 %v415_v11  ;;  %p481_p2 = scmp.ne.s32.totalorder %s325_s14, %s480_s2  ;;  %p486_p4 = scmp.lt.s32.totalorder %s480_s2, %s480_s2 }
  0x34   :  { %v91_v33 = vrot.slane %v78_v30, %v90_v29  ;;  %v83_v34 = vrot.slane %v78_v30, %v82_v31  ;;  %v87_v35 = vrot.slane %v78_v30, %v86_v32 }
  0x35   :  { %p487_p5 = por %p486_p4, %p485_p3 }
  0x36   :  { %378 = vmatpush3.bf16.msra.mxu1 %v417_v12  ;;  %236 = vmatpush1.bf16.msra.mxu0 %v418_v13 }
  0x37   :  { %379 = vmatprep.subr.bf16.mxu1 %v514_v0  ;;  %237 = vmatprep.subr.bf16.mxu0 %v419_v14  ;;  %p488_p6 = pnand %p487_p5, %p481_p2 }
  0x3a   :  { %380 = vmatpush3.bf16.msra.mxu1 %v421_v15  ;;  %238 = vmatpush1.bf16.msra.mxu0 %v422_v16 }
  0x3b   :  { %381 = vmatprep.subr.bf16.mxu1 %v514_v0  ;;  %239 = vmatprep.subr.bf16.mxu0 %v423_v17 }
  0x3e   :  { %382 = vmatpush3.bf16.msra.mxu1 %v425_v18  ;;  %240 = vmatpush1.bf16.msra.mxu0 %v426_v19 }
  0x3f   :  { %383 = vmatprep.subr.bf16.mxu1 %v514_v0  ;;  %241 = vmatprep.subr.bf16.mxu0 %v427_v20 }
  0x42   :  { %384 = vmatpush3.bf16.msra.mxu1 %v429_v21  ;;  %242 = vmatpush1.bf16.msra.mxu0 %v430_v22 }
  0x43   :  { %385 = vmatprep.subr.bf16.mxu1 %v514_v0  ;;  %243 = vmatprep.subr.bf16.mxu0 %v431_v23 }
  0x46   :  { %386 = vmatpush3.bf16.msra.mxu1 %v433_v24  ;;  %244 = vmatpush1.bf16.msra.mxu0 %v434_v25 }
  0x49   :  { %388 = vmatmul.mubr.bf16.vlgmr.msra.gmra.mrb[0].mxu1 %v435_v26  ;;  %262 = vmatmul.mubr.bf16.vlgmr.msra.gmra.mrb[0].mxu0 %v435_v26 }
 0x11c   :  { %v306_v36 = vpop.f32.mrb[0].mxu1  ;;  %v263_v38 = vpop.f32.mrb[0].mxu0 }
 0x11d   :  { %v307_v37 = vadd.f32 %v306_v36, %v91_v33  ;;  %v389_v39 = vpop.f32.mrb[1].mxu1  ;;  %v264_v40 = vadd.f32 %v263_v38, %v83_v34  ;;  %v265_v41 = vpop.f32.mrb[1].mxu0 }
 0x11e   :  { %v309_v42 = vpop.f32.mrb[2].mxu1  ;;  %v266_v43 = vadd.f32 %v265_v41, %v87_v35  ;;  %v267_v45 = vpop.f32.mrb[2].mxu0 }
 0x11f   :  { %315 = vst [vmem:[#allocation7 + $0x10] sm:$0xff] %v307_v37  ;;  %v310_v44 = vadd.f32 %v309_v42, %v91_v33  ;;  %v390_v46 = vpop.f32.mrb[3].mxu1  ;;  %313 = vst [vmem:[#allocation7] sm:$0xff] %v264_v40  ;;  %v268_v47 = vadd.f32 %v267_v45, %v83_v34  ;;  %v269_v48 = vpop.f32.mrb[3].mxu0 }
 0x120   :  { %314 = vst [vmem:[#allocation7 + $0x8] sm:$0xff] %v266_v43  ;;  %v270_v49 = vadd.f32 %v269_v48, %v87_v35 }
 0x121   :  { %318 = vst [vmem:[#allocation7 + $0x28] sm:$0xff] %v310_v44  ;;  %316 = vst [vmem:[#allocation7 + $0x18] sm:$0xff] %v268_v47 }
 0x122   :  { %317 = vst [vmem:[#allocation7 + $0x20] sm:$0xff] %v270_v49 }
 0x123   :  { %491 = shalt.err (!%p488_p6)
}
 0x124   :  { %s492_s17 = scalar_lea.hbm %s582_s3, 768 }
 0x125   :  { %p493_p7 = scmp.ne.s32.totalorder %s582_s3, %s492_s17  ;;  %p496_p8 = scmp.lt.u32.totalorder %s492_s17, %s582_s3 }
 0x127   :  { %p498_p9 = pnand %p496_p8, %p493_p7 }
 0x129   :  { %501 = shalt.err (!%p498_p9)
}
 0x12a   :  { %s518_s22 = smov 384   ;;  %s519_s23 = smov 24  }
 0x12b   :  { %330 = dma.vmem_to_hbm [thread:$0]  %s325_s14, 768, %s582_s3, [#allocation4], %s518_s22, %s518_s22, %s519_s23  }
 0x12c   :  { %506 = dma.done.wait [#allocation4], 768  }
 0x12d   :  { %507 = vsyncadd [#allocation4], 4294966528 }
 0x12e   :  { %334 = vsyncpa [#allocation3], 1 }
 0x12f   :  { %335 = vsyncpa [#allocation6], 1 }
 0x130   :  { %336 = vsyncpa [#allocation4], 1 }

</bundles_post_ra>
